<compile_context>
chip_gen: v5e
topology: v5e:2x2
jax: 0.10.0
libtpu: 0.0.40
codegen_flags: <defaults>
</compile_context>

<pallas_src>
import jax
import jax.numpy as jnp
from jax.experimental import pallas as pl
from jax.experimental.pallas import tpu as pltpu


def _round_up(x, m):
    return (x + m - 1) // m * m


def _test_wrapper_kernel(img_ref, w_enc_ref, b_enc_ref, w_head_ref, b_head_ref,
                         out_ref, acc_ref):
    # img_ref:    (tb, tk)     native dtype (f32 or bf16), flattened image tile
    # w_enc_ref:  (tk, E)      bf16 synthetic encoder weight tile
    # b_enc_ref:  (1, E)       f32
    # w_head_ref: (E, N_pad)   bf16 head weight, zero-padded to 128 lanes
    # b_head_ref: (1, N_pad)   f32
    # out_ref:    (tb, N_pad)  f32
    # acc_ref:    (tb, E)      f32 accumulator (persists across K steps)
    k = pl.program_id(1)

    @pl.when(k == 0)
    def _init():
        acc_ref[...] = jnp.zeros_like(acc_ref)

    # Cast to bf16 in-kernel (no HBM pre-pass); f32 accumulation on the MXU.
    img = img_ref[...].astype(jnp.bfloat16)
    acc_ref[...] += jnp.dot(img, w_enc_ref[...],
                            preferred_element_type=jnp.float32)

    @pl.when(k == pl.num_programs(1) - 1)
    def _epilogue():
        # synthetic CLIP image encoder epilogue: bias + L2-normalize (f32).
        feat = acc_ref[...] + b_enc_ref[...]
        inv_norm = jax.lax.rsqrt(
            jnp.sum(feat * feat, axis=-1, keepdims=True) + 1e-12)
        image_features = (feat * inv_norm).astype(jnp.bfloat16)
        # head: Linear(embed_dim, 2) on a lane-dense 128-wide slab, bf16 x bf16
        # operands with f32 accumulation.
        out = jnp.dot(image_features, w_head_ref[...],
                      preferred_element_type=jnp.float32)
        out_ref[...] = (out + b_head_ref[...]).astype(out_ref.dtype)


def test_wrapper_forward(image, text, params, *, tk_target=2048):
    """image: (B, C, H, W); text is unused for the image_features branch."""
    del text  # CLIP image_features do not depend on the text branch
    B = image.shape[0]
    x = image.reshape(B, -1)                        # keep native dtype; cast in-kernel
    D_in = x.shape[1]

    w_enc = params["w_enc"].astype(jnp.bfloat16)    # (D_in, E)
    b_enc = params["b_enc"].astype(jnp.float32)     # (1, E)
    w_head = params["w_head"].astype(jnp.bfloat16)  # (E, 2) streamed bf16
    b_head = params["b_head"].astype(jnp.float32)   # (1, 2)
    E = w_enc.shape[1]
    n_out = w_head.shape[1]

    # ---- K tiling: pad only to 128, then pick tk as a divisor of D_pad -----
    D_pad = _round_up(D_in, 128)
    if D_pad <= tk_target:
        tk = D_pad
    else:
        m = D_pad // 128
        best = max(d for d in range(1, tk_target // 128 + 1) if m % d == 0)
        tk = best * 128
        if tk < 512:
            # no reasonable divisor: accept modest zero padding for 1024-wide tiles
            tk = 1024
            D_pad = _round_up(D_in, tk)

    # ---- batch tiling: 16-row granule (bf16 sublane), >=2 blocks when big ---
    B16 = _round_up(B, 16)
    if B16 <= 16:
        tb = B16
    else:
        tb = min(512, _round_up((B16 + 1) // 2, 16))
    B_pad = _round_up(B, tb)

    N_pad = _round_up(n_out, 128)                   # lane-dense head output slab

    # ---- pad operands (no-ops when already aligned) -------------------------
    if (B_pad, D_pad) != (B, D_in):
        x = jnp.pad(x, ((0, B_pad - B), (0, D_pad - D_in)))
    if D_pad != D_in:
        w_enc = jnp.pad(w_enc, ((0, D_pad - D_in), (0, 0)))
    w_head_p = jnp.pad(w_head, ((0, 0), (0, N_pad - n_out)))
    b_head_p = jnp.pad(b_head, ((0, 0), (0, N_pad - n_out)))

    nb, nk = B_pad // tb, D_pad // tk
    x_isz = jnp.dtype(x.dtype).itemsize

    cost = pl.CostEstimate(
        flops=2 * B_pad * D_pad * E + 2 * B_pad * E * N_pad,
        transcendentals=B_pad,
        bytes_accessed=(x.size * x_isz                 # image streamed once
                        + nb * w_enc.size * 2          # w_enc re-streamed per batch block
                        + b_enc.size * 4
                        + w_head_p.size * 2 + b_head_p.size * 4
                        + B_pad * N_pad * 4),
    )

    # Conservative double-buffered VMEM footprint (lane padding on E included).
    E_vmem = _round_up(E, 128)
    vmem_bytes = (2 * tb * tk * x_isz + 2 * tk * E_vmem * 2
                  + 2 * E_vmem * 4 + 2 * E_vmem * N_pad * 2
                  + 2 * N_pad * 4 + 2 * tb * N_pad * 4 + tb * E_vmem * 4)
    vmem_limit = int(min(max(2 * vmem_bytes, 32 << 20), 64 << 20))

    out_full = pl.pallas_call(
        _test_wrapper_kernel,
        out_shape=jax.ShapeDtypeStruct((B_pad, N_pad), jnp.float32),
        grid_spec=pltpu.PrefetchScalarGridSpec(
            num_scalar_prefetch=0,
            grid=(nb, nk),
            in_specs=[
                pl.BlockSpec((tb, tk), lambda b, k: (b, k)),       # image tile
                pl.BlockSpec((tk, E), lambda b, k: (k, 0)),        # encoder weight tile
                pl.BlockSpec((1, E), lambda b, k: (0, 0)),         # encoder bias
                pl.BlockSpec((E, N_pad), lambda b, k: (0, 0)),     # head weight (padded N)
                pl.BlockSpec((1, N_pad), lambda b, k: (0, 0)),     # head bias (padded N)
            ],
            out_specs=pl.BlockSpec((tb, N_pad), lambda b, k: (b, 0)),
            scratch_shapes=[pltpu.VMEM((tb, E), jnp.float32)],
        ),
        compiler_params=pltpu.CompilerParams(
            dimension_semantics=("parallel", "arbitrary"),
            vmem_limit_bytes=vmem_limit),
        cost_estimate=cost,
    )(x, w_enc, b_enc, w_head_p, b_head_p)

    return {"test_output": out_full[:B, :n_out]}


def make_params(key, d_in, embed_dim):
    k1, k2, k3, k4 = jax.random.split(key, 4)
    # Deterministic synthetic weights (no checkpoint load).
    w_enc = (jax.random.normal(k1, (d_in, embed_dim), jnp.float32)
             * 0.02).astype(jnp.bfloat16)
    b_enc = jax.random.normal(k2, (1, embed_dim), jnp.float32) * 0.01
    # nn.Linear(embed_dim, 2): weight (2, embed_dim) stored transposed (embed_dim, 2)
    w_head = jax.random.normal(k3, (embed_dim, 2), jnp.float32) * (1.0 / embed_dim ** 0.5)
    b_head = jax.random.normal(k4, (1, 2), jnp.float32) * 0.01
    return {"w_enc": w_enc, "b_enc": b_enc, "w_head": w_head, "b_head": b_head}


def reference_forward(image, params):
    # Mirrors the kernel arithmetic: bf16 operands, f32 accumulation, bf16 head.
    x = image.reshape(image.shape[0], -1).astype(jnp.bfloat16)
    w_enc = params["w_enc"].astype(jnp.bfloat16)
    feat = jnp.dot(x, w_enc, preferred_element_type=jnp.float32) + params["b_enc"]
    feat = feat * jax.lax.rsqrt(
        jnp.sum(feat * feat, axis=-1, keepdims=True) + 1e-12)
    return (jnp.dot(feat.astype(jnp.bfloat16),
                    params["w_head"].astype(jnp.bfloat16),
                    preferred_element_type=jnp.float32)
            + params["b_head"])


if __name__ == "__main__":
    key = jax.random.PRNGKey(0)
    k_img, k_txt, k_par = jax.random.split(key, 3)

    B, C, H, W = 2, 3, 16, 16          # small NCHW image
    embed_dim = 32                      # small 'embed_dim' from model config
    seq = 8
    image = jax.random.normal(k_img, (B, C, H, W), jnp.float32)
    text = jax.random.randint(k_txt, (B, seq), 0, 100)  # unused by image branch

    params = make_params(k_par, C * H * W, embed_dim)

    result = test_wrapper_forward(image, text, params)
    out = jax.block_until_ready(result["test_output"])

    ref = reference_forward(image, params)
    assert out.shape == (B, 2), out.shape
    assert jnp.allclose(out, ref, atol=1e-3, rtol=1e-3), (out, ref)

    print("KERNEL_OK")
</pallas_src>

<mosaic_0001>
module attributes {stable_mosaic.version = 11 : i64} {
  func.func @_test_wrapper_kernel(%arg0: i32, %arg1: i32, %arg2: memref<16x768xf32, #tpu.memory_space<vmem>>, %arg3: memref<768x32xbf16, #tpu.memory_space<vmem>>, %arg4: memref<1x32xf32, #tpu.memory_space<vmem>>, %arg5: memref<32x128xbf16, #tpu.memory_space<vmem>>, %arg6: memref<1x128xf32, #tpu.memory_space<vmem>>, %arg7: memref<16x128xf32, #tpu.memory_space<vmem>>, %arg8: memref<16x32xf32, #tpu.memory_space<vmem>>) attributes {dimension_semantics = [#tpu.dimension_semantics<parallel>, #tpu.dimension_semantics<arbitrary>], iteration_bounds = array<i64: 1, 1>, scalar_prefetch = 0 : i64, scratch_operands = 1 : i64, tpu.core_type = #tpu.core_type<tc>, window_params = [{transform_indices = @transform_0, window_bounds = array<i64: 16, 768>}, {transform_indices = @transform_1, window_bounds = array<i64: 768, 32>}, {pipeline_mode = #tpu.pipeline_mode<synchronous>, transform_indices = @transform_2, window_bounds = array<i64: 1, 32>}, {pipeline_mode = #tpu.pipeline_mode<synchronous>, transform_indices = @transform_3, window_bounds = array<i64: 32, 128>}, {pipeline_mode = #tpu.pipeline_mode<synchronous>, transform_indices = @transform_4, window_bounds = array<i64: 1, 128>}, {transform_indices = @transform_5, window_bounds = array<i64: 16, 128>}]} {
    %c0_i32 = arith.constant 0 : i32
    %0 = arith.cmpi eq, %arg1, %c0_i32 : i32
    %1 = arith.extui %0 : i1 to i32
    %c0_i32_0 = arith.constant 0 : i32
    %2 = arith.cmpi ne, %1, %c0_i32_0 : i32
    scf.if %2 {
      %cst_10 = arith.constant 0.000000e+00 : f32
      %13 = vector.broadcast %cst_10 : f32 to vector<16x32xf32>
      %c0_11 = arith.constant 0 : index
      %c0_12 = arith.constant 0 : index
      %14 = vector.load %arg8[%c0_11, %c0_12] : memref<16x32xf32, #tpu.memory_space<vmem>>, vector<16x32xf32>
      tpu.vector_store %arg8[%c0_11, %c0_12], %13 {strides = array<i32>} : memref<16x32xf32, #tpu.memory_space<vmem>>, vector<16x32xf32>,
    } else {
    }
    %c0 = arith.constant 0 : index
    %c0_1 = arith.constant 0 : index
    %3 = vector.load %arg2[%c0, %c0_1] : memref<16x768xf32, #tpu.memory_space<vmem>>, vector<16x768xf32>
    %4 = arith.truncf %3 : vector<16x768xf32> to vector<16x768xbf16>
    %c0_2 = arith.constant 0 : index
    %c0_3 = arith.constant 0 : index
    %5 = vector.load %arg8[%c0_2, %c0_3] : memref<16x32xf32, #tpu.memory_space<vmem>>, vector<16x32xf32>
    %c0_4 = arith.constant 0 : index
    %c0_5 = arith.constant 0 : index
    %6 = vector.load %arg3[%c0_4, %c0_5] : memref<768x32xbf16, #tpu.memory_space<vmem>>, vector<768x32xbf16>
    %cst = arith.constant dense<0.000000e+00> : vector<16x32xf32>
    %7 = tpu.matmul %4, %6, %cst {dimension_numbers = #tpu.dot_dimension_numbers<[1], [0], [0], [1], [0, 0, 1, 1], [], []>} : vector<16x768xbf16>, vector<768x32xbf16>, vector<16x32xf32> -> vector<16x32xf32>
    %8 = arith.addf %5, %7 : vector<16x32xf32>
    %c0_6 = arith.constant 0 : index
    %c0_7 = arith.constant 0 : index
    %9 = vector.load %arg8[%c0_6, %c0_7] : memref<16x32xf32, #tpu.memory_space<vmem>>, vector<16x32xf32>
    tpu.vector_store %arg8[%c0_6, %c0_7], %8 {strides = array<i32>} : memref<16x32xf32, #tpu.memory_space<vmem>>, vector<16x32xf32>,
    %c0_i32_8 = arith.constant 0 : i32
    %10 = arith.cmpi eq, %arg1, %c0_i32_8 : i32
    %11 = arith.extui %10 : i1 to i32
    %c0_i32_9 = arith.constant 0 : i32
    %12 = arith.cmpi ne, %11, %c0_i32_9 : i32
    scf.if %12 {
      %c0_10 = arith.constant 0 : index
      %c0_11 = arith.constant 0 : index
      %13 = vector.load %arg8[%c0_10, %c0_11] : memref<16x32xf32, #tpu.memory_space<vmem>>, vector<16x32xf32>
      %c0_12 = arith.constant 0 : index
      %c0_13 = arith.constant 0 : index
      %14 = vector.load %arg4[%c0_12, %c0_13] : memref<1x32xf32, #tpu.memory_space<vmem>>, vector<1x32xf32>
      %15 = vector.broadcast %14 : vector<1x32xf32> to vector<16x32xf32>
      %16 = arith.addf %13, %15 : vector<16x32xf32>
      %17 = arith.mulf %16, %16 : vector<16x32xf32>
      %cst_14 = arith.constant dense<0.000000e+00> : vector<16xf32>
      %18 = vector.multi_reduction <add>, %17, %cst_14 [1] : vector<16x32xf32> to vector<16xf32>
      %19 = vector.shape_cast %18 : vector<16xf32> to vector<16x1xf32>
      %cst_15 = arith.constant 9.99999996E-13 : f32
      %20 = vector.broadcast %cst_15 : f32 to vector<16x1xf32>
      %21 = arith.addf %19, %20 : vector<16x1xf32>
      %22 = math.rsqrt %21 : vector<16x1xf32>
      %23 = vector.broadcast %22 : vector<16x1xf32> to vector<16x32xf32>
      %24 = arith.mulf %16, %23 : vector<16x32xf32>
      %25 = arith.truncf %24 : vector<16x32xf32> to vector<16x32xbf16>
      %c0_16 = arith.constant 0 : index
      %c0_17 = arith.constant 0 : index
      %26 = vector.load %arg5[%c0_16, %c0_17] : memref<32x128xbf16, #tpu.memory_space<vmem>>, vector<32x128xbf16>
      %cst_18 = arith.constant dense<0.000000e+00> : vector<16x128xf32>
      %27 = tpu.matmul %25, %26, %cst_18 {dimension_numbers = #tpu.dot_dimension_numbers<[1], [0], [0], [1], [0, 0, 1, 1], [], []>} : vector<16x32xbf16>, vector<32x128xbf16>, vector<16x128xf32> -> vector<16x128xf32>
      %c0_19 = arith.constant 0 : index
      %c0_20 = arith.constant 0 : index
      %28 = vector.load %arg6[%c0_19, %c0_20] : memref<1x128xf32, #tpu.memory_space<vmem>>, vector<1x128xf32>
      %29 = vector.broadcast %28 : vector<1x128xf32> to vector<16x128xf32>
      %30 = arith.addf %27, %29 : vector<16x128xf32>
      %c0_21 = arith.constant 0 : index
      %c0_22 = arith.constant 0 : index
      %31 = vector.load %arg7[%c0_21, %c0_22] : memref<16x128xf32, #tpu.memory_space<vmem>>, vector<16x128xf32>
      tpu.vector_store %arg7[%c0_21, %c0_22], %30 {strides = array<i32>} : memref<16x128xf32, #tpu.memory_space<vmem>>, vector<16x128xf32>,
    } else {
    }
    return
  }
  func.func @transform_0(%arg0: i32, %arg1: i32) -> (i32, i32) {
    %c0_i32 = arith.constant 0 : i32
    return %arg0, %arg1 : i32, i32
  }
  func.func @transform_1(%arg0: i32, %arg1: i32) -> (i32, i32) {
    %c0_i32 = arith.constant 0 : i32
    %c0_i32_0 = arith.constant 0 : i32
    return %arg1, %c0_i32 : i32, i32
  }
  func.func @transform_2(%arg0: i32, %arg1: i32) -> (i32, i32) {
    %c0_i32 = arith.constant 0 : i32
    %c0_i32_0 = arith.constant 0 : i32
    %c0_i32_1 = arith.constant 0 : i32
    return %c0_i32, %c0_i32_0 : i32, i32
  }
  func.func @transform_3(%arg0: i32, %arg1: i32) -> (i32, i32) {
    %c0_i32 = arith.constant 0 : i32
    %c0_i32_0 = arith.constant 0 : i32
    %c0_i32_1 = arith.constant 0 : i32
    return %c0_i32, %c0_i32_0 : i32, i32
  }
  func.func @transform_4(%arg0: i32, %arg1: i32) -> (i32, i32) {
    %c0_i32 = arith.constant 0 : i32
    %c0_i32_0 = arith.constant 0 : i32
    %c0_i32_1 = arith.constant 0 : i32
    return %c0_i32, %c0_i32_0 : i32, i32
  }
  func.func @transform_5(%arg0: i32, %arg1: i32) -> (i32, i32) {
    %c0_i32 = arith.constant 0 : i32
    %c0_i32_0 = arith.constant 0 : i32
    return %arg0, %c0_i32 : i32, i32
  }
}

</mosaic_0001>

<bundles_post_ra>
// kernel: tpu_custom_call.1
= control target key start
LH: loop header
LB: loop body
LE: loop exit
PB: predicated region body
PF: predicated region fallthrough
CT: control target
= control target key end

     0   :  { %s1146_s0 = inlined_call_operand.vmem [shape: f32[16,768], index: 0, kind: input, shape index: {}]   ;;  %s1147_s1 = inlined_call_operand.vmem [shape: bf16[768,32], index: 1, kind: input, shape index: {}]   ;;  %s1148_s2 = inlined_call_operand.vmem [shape: f32[1,32], index: 2, kind: input, shape index: {}]   ;;  %s1149_s3 = inlined_call_operand.vmem [shape: bf16[32,128], index: 3, kind: input, shape index: {}]   ;;  %s1150_s4 = inlined_call_operand.vmem [shape: f32[1,128], index: 4, kind: input, shape index: {}]   ;;  %s1151_s5 = inlined_call_operand.hbm [shape: f32[16,128], index: 5, kind: output, shape index: {}]  }
   0x1   :  { %v831_v0 = vld [vmem:[%s1147_s1 + $0x38] sm:$0xff]  ;;  %v830_v4 = vld [vmem:[%s1147_s1 + $0x30] sm:$0xff]  ;;  %v829_v8 = vld [vmem:[%s1147_s1 + $0x28] sm:$0xff] }
   0x2   :  { %v839_v1 = vld [vmem:[%s1147_s1 + $0x78] sm:$0xff]  ;;  %433 = vmatpush.bf16.msra.mxu0 %v831_v0  ;;  %v838_v5 = vld [vmem:[%s1147_s1 + $0x70] sm:$0xff]  ;;  %v837_v9 = vld [vmem:[%s1147_s1 + $0x68] sm:$0xff] }
   0x3   :  { %v847_v2 = vld [vmem:[%s1147_s1 + $0xb8] sm:$0xff]  ;;  %447 = vmatpush.bf16.msra.mxu1 %v839_v1  ;;  %v846_v6 = vld [vmem:[%s1147_s1 + $0xb0] sm:$0xff]  ;;  %v845_v10 = vld [vmem:[%s1147_s1 + $0xa8] sm:$0xff] }
   0x4   :  { %v855_v3 = vld [vmem:[%s1147_s1 + $0xf8] sm:$0xff]  ;;  %461 = vmatpush.bf16.msra.mxu2 %v847_v2  ;;  %v854_v7 = vld [vmem:[%s1147_s1 + $0xf0] sm:$0xff]  ;;  %v853_v11 = vld [vmem:[%s1147_s1 + $0xe8] sm:$0xff] }
   0x5   :  { %475 = vmatpush.bf16.msra.mxu3 %v855_v3  ;;  %v828_v12 = vld [vmem:[%s1147_s1 + $0x20] sm:$0xff]  ;;  %v827_v16 = vld [vmem:[%s1147_s1 + $0x18] sm:$0xff] }
   0x6   :  { %434 = vmatpush.bf16.msra.mxu0 %v830_v4  ;;  %v836_v13 = vld [vmem:[%s1147_s1 + $0x60] sm:$0xff]  ;;  %v835_v17 = vld [vmem:[%s1147_s1 + $0x58] sm:$0xff] }
   0x7   :  { %448 = vmatpush.bf16.msra.mxu1 %v838_v5  ;;  %v844_v14 = vld [vmem:[%s1147_s1 + $0xa0] sm:$0xff]  ;;  %v843_v18 = vld [vmem:[%s1147_s1 + $0x98] sm:$0xff] }
   0x8   :  { %462 = vmatpush.bf16.msra.mxu2 %v846_v6  ;;  %v852_v15 = vld [vmem:[%s1147_s1 + $0xe0] sm:$0xff]  ;;  %v851_v19 = vld [vmem:[%s1147_s1 + $0xd8] sm:$0xff] }
   0x9   :  { %476 = vmatpush.bf16.msra.mxu3 %v854_v7 }
   0xa   :  { %435 = vmatpush.bf16.msra.mxu0 %v829_v8 }
   0xb   :  { %449 = vmatpush.bf16.msra.mxu1 %v837_v9 }
   0xc   :  { %463 = vmatpush.bf16.msra.mxu2 %v845_v10 }
   0xd   :  { %477 = vmatpush.bf16.msra.mxu3 %v853_v11 }
   0xe   :  { %436 = vmatpush.bf16.msra.mxu0 %v828_v12 }
   0xf   :  { %450 = vmatpush.bf16.msra.mxu1 %v836_v13 }
  0x10   :  { %464 = vmatpush.bf16.msra.mxu2 %v844_v14 }
  0x11   :  { %478 = vmatpush.bf16.msra.mxu3 %v852_v15 }
  0x12   :  { %10 = vsyncpa [#allocation4], 0  ;;  %437 = vmatpush.bf16.msra.mxu0 %v827_v16  ;;  %v826_v20 = vld [vmem:[%s1147_s1 + $0x10] sm:$0xff]  ;;  %v825_v24 = vld [vmem:[%s1147_s1 + $0x8] sm:$0xff]  ;;  %vm26_vm0 = vcmask 261120   ;;  %v910_v2 = vmov 0.0  }
  0x13   :  { %451 = vmatpush.bf16.msra.mxu1 %v835_v17  ;;  %v834_v21 = vld [vmem:[%s1147_s1 + $0x50] sm:$0xff]  ;;  %v833_v25 = vld [vmem:[%s1147_s1 + $0x48] sm:$0xff]  ;;  %v824_v28 = vld [vmem:[%s1147_s1] sm:$0xff]  ;;  %27 = vst.msk [vmem:[#allocation2] sm:$0xff] %vm26_vm0, %v910_v2  ;;  %s911_s17 = smov [#allocation3]   ;;  %s611_s21 = sshll.u32 %s1151_s5, 4  ;;  %s612_s21 = int_to_ptr.hbm [resolvable:$true] %s611_s21 }
  0x14   :  { %465 = vmatpush.bf16.msra.mxu2 %v843_v18  ;;  %v842_v22 = vld [vmem:[%s1147_s1 + $0x90] sm:$0xff]  ;;  %v841_v26 = vld [vmem:[%s1147_s1 + $0x88] sm:$0xff]  ;;  %v832_v29 = vld [vmem:[%s1147_s1 + $0x40] sm:$0xff]  ;;  %28 = vst.msk [vmem:[#allocation2 + $0x8] sm:$0xff] %vm26_vm0, %v910_v2  ;;  %s609_s18 = sshll.u32 %s911_s17, 4  ;;  %s912_s22 = smov 128   ;;  %s610_s18 = int_to_ptr.vmem [resolvable:$true] %s609_s18 }
  0x15   :  { %479 = vmatpush.bf16.msra.mxu3 %v851_v19  ;;  %v850_v23 = vld [vmem:[%s1147_s1 + $0xd0] sm:$0xff]  ;;  %v849_v27 = vld [vmem:[%s1147_s1 + $0xc8] sm:$0xff]  ;;  %v840_v30 = vld [vmem:[%s1147_s1 + $0x80] sm:$0xff]  ;;  %s913_s23 = smov 8  }
  0x16   :  { %438 = vmatpush.bf16.msra.mxu0 %v826_v20  ;;  %v863_v31 = vld [vmem:[%s1147_s1 + $0x138] sm:$0xff]  ;;  %v29_v32 = vld [vmem:[%s1146_s0] sm:$0xff]  ;;  %v35_v33 = vld [vmem:[%s1146_s0 + $0x30] sm:$0xff] }
  0x17   :  { %452 = vmatpush.bf16.msra.mxu1 %v834_v21  ;;  %v30_v34 = vld [vmem:[%s1146_s0 + $0x8] sm:$0xff]  ;;  %v36_v35 = vld [vmem:[%s1146_s0 + $0x38] sm:$0xff]  ;;  %v31_v37 = vld [vmem:[%s1146_s0 + $0x10] sm:$0xff]  ;;  %v41_v42 = vpack.c.bf16 %v35_v33, %v29_v32 }
  0x18   :  { %466 = vmatpush.bf16.msra.mxu2 %v842_v22  ;;  %v871_v36 = vld [vmem:[%s1147_s1 + $0x178] sm:$0xff]  ;;  %v37_v38 = vld [vmem:[%s1146_s0 + $0x40] sm:$0xff]  ;;  %v38_v41 = vld [vmem:[%s1146_s0 + $0x48] sm:$0xff]  ;;  %v42_v43 = vpack.c.bf16 %v36_v35, %v30_v34 }
  0x19   :  { %480 = vmatpush.bf16.msra.mxu3 %v850_v23  ;;  %v848_v39 = vld [vmem:[%s1147_s1 + $0xc0] sm:$0xff]  ;;  %v32_v40 = vld [vmem:[%s1146_s0 + $0x18] sm:$0xff]  ;;  %v43_v44 = vpack.c.bf16 %v37_v38, %v31_v37  ;;  %v862_v45 = vld [vmem:[%s1147_s1 + $0x130] sm:$0xff] }
  0x1a   :  { %439 = vmatpush.bf16.msra.mxu0 %v825_v24  ;;  %v44_v46 = vpack.c.bf16 %v38_v41, %v32_v40  ;;  %v870_v47 = vld [vmem:[%s1147_s1 + $0x170] sm:$0xff]  ;;  %v861_v48 = vld [vmem:[%s1147_s1 + $0x128] sm:$0xff]  ;;  %v860_v50 = vld [vmem:[%s1147_s1 + $0x120] sm:$0xff] }
  0x1b   :  { %453 = vmatpush.bf16.msra.mxu1 %v833_v25  ;;  %v869_v49 = vld [vmem:[%s1147_s1 + $0x168] sm:$0xff]  ;;  %v868_v51 = vld [vmem:[%s1147_s1 + $0x160] sm:$0xff]  ;;  %v859_v52 = vld [vmem:[%s1147_s1 + $0x118] sm:$0xff] }
  0x1c   :  { %467 = vmatpush.bf16.msra.mxu2 %v841_v26  ;;  %v867_v53 = vld [vmem:[%s1147_s1 + $0x158] sm:$0xff]  ;;  %v858_v54 = vld [vmem:[%s1147_s1 + $0x110] sm:$0xff]  ;;  %v857_v56 = vld [vmem:[%s1147_s1 + $0x108] sm:$0xff] }
  0x1d   :  { %481 = vmatpush.bf16.msra.mxu3 %v849_v27  ;;  %v866_v55 = vld [vmem:[%s1147_s1 + $0x150] sm:$0xff]  ;;  %v865_v57 = vld [vmem:[%s1147_s1 + $0x148] sm:$0xff]  ;;  %v856_v58 = vld [vmem:[%s1147_s1 + $0x100] sm:$0xff] }
  0x1e   :  { %440 = vmatpush.bf16.msra.mxu0 %v824_v28  ;;  %v33_v59 = vld [vmem:[%s1146_s0 + $0x20] sm:$0xff]  ;;  %v39_v60 = vld [vmem:[%s1146_s0 + $0x50] sm:$0xff]  ;;  %v34_v62 = vld [vmem:[%s1146_s0 + $0x28] sm:$0xff] }
  0x1f   :  { %454 = vmatpush.bf16.msra.mxu1 %v832_v29  ;;  %v864_v61 = vld [vmem:[%s1147_s1 + $0x140] sm:$0xff]  ;;  %v40_v63 = vld [vmem:[%s1146_s0 + $0x58] sm:$0xff]  ;;  %v45_v0 = vpack.c.bf16 %v39_v60, %v33_v59  ;;  %v48_v25 = vld [vmem:[#allocation2 + $0x8] sm:$0xff] }
  0x20   :  { %468 = vmatpush.bf16.msra.mxu2 %v840_v30  ;;  %v46_v1 = vpack.c.bf16 %v40_v63, %v34_v62  ;;  %v47_v17 = vld [vmem:[#allocation2] sm:$0xff]  ;;  %v873_v38 = vld [vmem:[%s1149_s3 + $0x8] sm:$0xff] }
  0x21   :  { %482 = vmatpush.bf16.msra.mxu3 %v848_v39  ;;  %441 = vmatmul.bf16.vlgmr.msra.gmra.mxu0 %v41_v42  ;;  %v878_v28 = vld [vmem:[%s1148_s2] ss:$0 sm:$0xff] }
  0x22   :  { %489 = vmatpush.bf16.msrb.mxu0 %v863_v31  ;;  %455 = vmatmul.bf16.vlgmr.msra.gmra.mxu1 %v42_v43  ;;  %v872_v39 = vld [vmem:[%s1149_s3] sm:$0xff] }
  0x23   :  { %503 = vmatpush.bf16.msrb.mxu1 %v871_v36  ;;  %469 = vmatmul.bf16.vlgmr.msra.gmra.mxu2 %v43_v44 }
  0x24   :  { %483 = vmatmul.bf16.vlgmr.msra.gmra.mxu3 %v44_v46  ;;  %595 = vmatpush.bf16.msrb.mxu2 %v873_v38 }
  0x26   :  { %490 = vmatpush.bf16.msrb.mxu0 %v862_v45 }
  0x27   :  { %504 = vmatpush.bf16.msrb.mxu1 %v870_v47 }
  0x28   :  { %596 = vmatpush.bf16.msrb.mxu2 %v872_v39 }
  0x2a   :  { %491 = vmatpush.bf16.msrb.mxu0 %v861_v48 }
  0x2b   :  { %505 = vmatpush.bf16.msrb.mxu1 %v869_v49 }
  0x2e   :  { %492 = vmatpush.bf16.msrb.mxu0 %v860_v50 }
  0x2f   :  { %506 = vmatpush.bf16.msrb.mxu1 %v868_v51 }
  0x32   :  { %493 = vmatpush.bf16.msrb.mxu0 %v859_v52 }
  0x33   :  { %507 = vmatpush.bf16.msrb.mxu1 %v867_v53 }
  0x36   :  { %494 = vmatpush.bf16.msrb.mxu0 %v858_v54 }
  0x37   :  { %508 = vmatpush.bf16.msrb.mxu1 %v866_v55 }
  0x3a   :  { %495 = vmatpush.bf16.msrb.mxu0 %v857_v56 }
  0x3b   :  { %509 = vmatpush.bf16.msrb.mxu1 %v865_v57 }
  0x3e   :  { %496 = vmatpush.bf16.msrb.mxu0 %v856_v58 }
  0x3f   :  { %510 = vmatpush.bf16.msrb.mxu1 %v864_v61  ;;  %v879_v61 = vld [vmem:[%s1150_s4] ss:$0 sm:$0xff] }
  0x41   :  { %497 = vmatmul.bf16.vlgmr.msrb.gmra.mxu0 %v45_v0 }
  0x42   :  { %511 = vmatmul.bf16.vlgmr.msrb.gmra.mxu1 %v46_v1 }
  0x9e   :  { %v442_v3 = vpop.f32.mrf.mxu0 }
  0x9f   :  { %v456_v4 = vpop.f32.mrf.mxu1 }
  0xa0   :  { %v457_v6 = vadd.f32 %v456_v4, %v442_v3 }
  0xa6   :  { %v470_v5 = vpop.f32.mrf.mxu2  ;;  %v444_v7 = vpop.f32.mrf.mxu0 }
  0xa7   :  { %v458_v8 = vpop.f32.mrf.mxu1  ;;  %v484_v9 = vpop.f32.mrf.mxu3  ;;  %v471_v10 = vadd.f32 %v470_v5, %v457_v6 }
  0xa8   :  { %v459_v12 = vadd.f32 %v458_v8, %v444_v7 }
  0xa9   :  { %v485_v11 = vadd.f32 %v484_v9, %v471_v10 }
  0xae   :  { %v472_v13 = vpop.f32.mrf.mxu2 }
  0xaf   :  { %v473_v18 = vadd.f32 %v472_v13, %v459_v12  ;;  %v486_v20 = vpop.f32.mrf.mxu3 }
  0xb1   :  { %v487_v22 = vadd.f32 %v486_v20, %v473_v18 }
  0xbe   :  { %v498_v14 = vpop.f32.mrf.mxu0 }
  0xbf   :  { %v499_v15 = vadd.f32 %v498_v14, %v485_v11  ;;  %v512_v16 = vpop.f32.mrf.mxu1 }
  0xc1   :  { %v513_v19 = vadd.f32 %v512_v16, %v499_v15 }
  0xc3   :  { %v517_v21 = vadd.f32 %v513_v19, %v47_v17 }
  0xc5   :  { %520 = vst.msk [vmem:[#allocation2] sm:$0xff] %vm26_vm0, %v517_v21 }
  0xc6   :  { %v500_v23 = vpop.f32.mrf.mxu0 }
  0xc7   :  { %v501_v24 = vadd.f32 %v500_v23, %v487_v22  ;;  %v514_v26 = vpop.f32.mrf.mxu1 }
  0xc9   :  { %v515_v27 = vadd.f32 %v514_v26, %v501_v24 }
  0xcb   :  { %v518_v29 = vadd.f32 %v515_v27, %v48_v25 }
  0xcc   :  { %v525_v30 = vld [vmem:[#allocation2] sm:$0xff] }
  0xcd   :  { %521 = vst.msk [vmem:[#allocation2 + $0x8] sm:$0xff] %vm26_vm0, %v518_v29  ;;  %v531_v31 = vadd.f32 %v878_v28, %v525_v30 }
  0xcf   :  { %v533_v32 = vmul.f32 %v531_v31, %v531_v31 }
  0xd1   :  { %v535_v33 = vsel %vm26_vm0, %v533_v32, 0.0 }
  0xd2   :  { %536 = vadd.xlane.f32.xlu0 %v535_v33 }
  0xd4   :  { %v526_v34 = vld [vmem:[#allocation2 + $0x8] sm:$0xff] }
  0xd5   :  { %v532_v35 = vadd.f32 %v878_v28, %v526_v34 }
  0xd7   :  { %v534_v36 = vmul.f32 %v532_v35, %v532_v35 }
  0xd9   :  { %v538_v37 = vsel %vm26_vm0, %v534_v36, 0.0 }
  0xda   :  { %539 = vadd.xlane.f32.xlu0 %v538_v37 }
 0x145   :  { %v537_v40 = vpop.xlane.xlu0 %536 }
 0x146   :  { %v541_v41 = vadd.f32 1e-12, %v537_v40 }
 0x148   :  { %880 = vrsqrt.f32 %v541_v41  ;;  %vm549_vm2 = vweird.f32 %v541_v41 }
 0x14d   :  { %v540_v42 = vpop.xlane.xlu0 %539 }
 0x14e   :  { %v881_v43 = vpop.eup %880  ;;  %v542_v44 = vadd.f32 1e-12, %v540_v42 }
 0x14f   :  { %v544_v45 = vmul.f32 %v881_v43, %v541_v41  ;;  %vm550_vm1 = vweird.f32 %v881_v43 }
 0x150   :  { %882 = vrsqrt.f32 %v542_v44  ;;  %vm551_vm4 = vmor %vm549_vm2, %vm550_vm1  ;;  %vm559_vm5 = vweird.f32 %v542_v44 }
 0x151   :  { %v545_v46 = vmul.f32 %v881_v43, %v544_v45 }
 0x153   :  { %v546_v47 = vmul.f32 0.5, %v545_v46 }
 0x155   :  { %v547_v49 = vsub.f32 1.5, %v546_v47 }
 0x156   :  { %v883_v48 = vpop.eup %882 }
 0x157   :  { %v554_v50 = vmul.f32 %v883_v48, %v542_v44  ;;  %v548_v52 = vmul.f32 %v881_v43, %v547_v49  ;;  %vm560_vm3 = vweird.f32 %v883_v48 }
 0x158   :  { %vm561_vm6 = vmor %vm559_vm5, %vm560_vm3 }
 0x159   :  { %v555_v51 = vmul.f32 %v883_v48, %v554_v50  ;;  %v552_v55 = vsel %vm551_vm4, %v881_v43, %v548_v52 }
 0x15a   :  { %v563_v58 = vmul.f32 %v552_v55, %v531_v31 }
 0x15b   :  { %v556_v53 = vmul.f32 0.5, %v555_v51 }
 0x15d   :  { %v557_v54 = vsub.f32 1.5, %v556_v53 }
 0x15f   :  { %v558_v56 = vmul.f32 %v883_v48, %v557_v54 }
 0x161   :  { %v562_v57 = vsel %vm561_vm6, %v883_v48, %v558_v56 }
 0x162   :  { %v564_v59 = vmul.f32 %v562_v57, %v532_v35 }
 0x164   :  { %v565_v60 = vpack.c.bf16 %v564_v59, %v563_v58 }
 0x166   :  { %823 = vmatmul.msk.bf16.vlgmr.msrb.gmra.mxu2 %vm26_vm0, %v565_v60 }
 0x1e9   :  { %v598_v62 = vpop.f32.mrf.mxu2 }
 0x1ea   :  { %v599_v63 = vadd.f32 %v879_v61, %v598_v62 }
 0x1ec   :  { %603 = vst [vmem:[#allocation3] sm:$0xff] %v599_v63 }
 0x1f1   :  { %v600_v0 = vpop.f32.mrf.mxu2 }
 0x1f2   :  { %v601_v1 = vadd.f32 %v879_v61, %v600_v0 }
 0x1f4   :  { %604 = vst [vmem:[#allocation3 + $0x8] sm:$0xff] %v601_v1 }
 0x1f5   :  { %617 = dma.vmem_to_hbm [thread:$0]  %s610_s18, 256, %s612_s21, [#allocation4], %s912_s22, %s912_s22, %s913_s23  }
 0x1f6   :  { %908 = dma.done.wait [#allocation4], 256  }
 0x1f7   :  { %909 = vsyncadd [#allocation4], 4294967040 }
 0x1f8   :  { %622 = vsyncpa [#allocation4], 1 }

</bundles_post_ra>
